<compile_context>
chip_gen: v6e
topology: v6e:2x2x1
jax: 0.10.0
libtpu: 0.0.40
codegen_flags: <defaults>
</compile_context>

<pallas_src>
import functools
import math

import jax
import jax.numpy as jnp
import numpy as np
from jax.experimental import pallas as pl
from jax.experimental.pallas import tpu as pltpu

_MIB = 1 << 20


# ---------------------------------------------------------------------------
# Hadamard matrix construction (host-side, cached)
# ---------------------------------------------------------------------------

@functools.lru_cache(maxsize=None)
def _sylvester_np(n: int) -> np.ndarray:
    """Sylvester Hadamard matrix H_n (entries +-1, int8); n a power of two."""
    assert n > 0 and (n & (n - 1)) == 0, "n must be a power of two"
    h = np.ones((1, 1), dtype=np.int8)
    while h.shape[0] < n:
        h = np.block([[h, h], [h, -h]])
    return h


@functools.lru_cache(maxsize=None)
def _hadamard_operand(n: int, repeat: int = 1) -> jax.Array:
    """Device-cached bf16 H_n (exact: entries are +-1); optionally the
    block-diagonal kron(I_repeat, H_n) used by the lane-packed small-n path."""
    h = _sylvester_np(n)
    if repeat > 1:
        h = np.kron(np.eye(repeat, dtype=np.int8), h)
    return jnp.asarray(h, dtype=jnp.bfloat16)


# ---------------------------------------------------------------------------
# In-kernel helpers
# ---------------------------------------------------------------------------

def _mxu_dot(x, h_bf16):
    """x @ H on the MXU with f32 accumulation.

    bf16 x  -> one native-rate bf16 matmul.
    other x -> LHS-only bf16 hi/lo split (2 passes).  H entries are +-1 (exact
    in bf16), so splitting only the LHS recovers ~f32 accuracy at a third of
    the MXU work of Precision.HIGHEST.
    """
    if x.dtype == jnp.bfloat16:
        return jnp.dot(x, h_bf16, preferred_element_type=jnp.float32)
    xf = x.astype(jnp.float32)
    hi = xf.astype(jnp.bfloat16)
    lo = (xf - hi.astype(jnp.float32)).astype(jnp.bfloat16)
    return (jnp.dot(hi, h_bf16, preferred_element_type=jnp.float32)
            + jnp.dot(lo, h_bf16, preferred_element_type=jnp.float32))


def _swap_minor(x3):
    """[r, p, q] -> [r, q, p] as one lane-layout-aware op when available."""
    einshape = getattr(pltpu, "einshape", None)
    if einshape is not None:
        try:
            return einshape("rpq->rqp", x3)
        except Exception:   # older jax / unsupported equation -> plain transpose
            pass
    return jnp.swapaxes(x3, 1, 2)


# ---------------------------------------------------------------------------
# Kernels
# ---------------------------------------------------------------------------

def _hadamard_dense_kernel(x_ref, h_ref, o_ref, *, scale):
    """o = (x @ H) * scale for one row tile; H is the full (n_eff, n_eff)."""
    o_ref[...] = (_mxu_dot(x_ref[...], h_ref[...]) * scale).astype(o_ref.dtype)


def _hadamard_kron_kernel(x_ref, ha_ref, hb_ref, o_ref, *, a, b, scale, row_chunk):
    """Large-n path: y = (x @ (H_a kron H_b)) * scale for one row tile.

    x_ref: [row_tile * a, b]  rows are (r, i) pairs, i the major sub-index.
    o_ref: [row_tile, a, b]   output (k, l) kept as separate minor dims; the
                              k*b + l merge happens as a free reshape outside.

    Two small MXU matmuls (n*(a+b) MACs/row instead of n*n) per sub-chunk, with
    exactly one lane-layout-aware relayout per stage; every reshape preserves
    the minor (lane) dim, so there is no lane<->sublane round trip of the big
    intermediate as in the old swapaxes/reshape formulation.
    """
    for c in range(o_ref.shape[0] // row_chunk):
        # Stage 1: contract the minor sub-index j (lane-dense, K = N = 128).
        t = _mxu_dot(x_ref[c * row_chunk * a:(c + 1) * row_chunk * a, :],
                     hb_ref[...])                                    # [(r,i), l]
        # Single relayout (r, i, l) -> (r, l, i); surrounding reshapes only
        # split / merge leading dims.
        t = _swap_minor(t.reshape(row_chunk, a, b)).reshape(row_chunk * b, a)
        # Stage 2: contract the major sub-index i.  The hi/lo split inside
        # _mxu_dot keeps the f32 stage-1 partial sums' accuracy.
        y = _mxu_dot(t, ha_ref[...])                                 # [(r,l), k]
        y = _swap_minor(y.reshape(row_chunk, b, a))                  # [r, k, l]
        o_ref[c * row_chunk:(c + 1) * row_chunk, :, :] = (
            (y * scale).astype(o_ref.dtype))


# ---------------------------------------------------------------------------
# Tiling / VMEM helpers
# ---------------------------------------------------------------------------

def _vmem_capacity_bytes() -> int:
    cap = 64 * _MIB                    # v7x per-TensorCore VMEM (smallest gen)
    try:
        cap = min(int(pltpu.get_tpu_info().vmem_capacity_bytes), 128 * _MIB)
    except Exception:
        pass
    # Everything here fits comfortably in 64 MiB (H is always bf16 and the
    # kron path caps dense H at <= 2048^2); clamping also guards against the
    # info query reporting the 2-TensorCore chip total on v7x.
    return min(cap, 64 * _MIB)


@functools.lru_cache(maxsize=None)
def _single_buffered_ok() -> bool:
    """Whether pipeline_mode=pl.Buffered(1) is available.  If not, the
    grid-invariant H operand is double-buffered and counted twice in VMEM."""
    buffered = getattr(pl, "Buffered", None)
    if buffered is None:
        return False
    try:
        pl.BlockSpec((8, 128), lambda i: (0, 0),
                     pipeline_mode=buffered(buffer_count=1))
        return True
    except Exception:
        return False


def _const_spec(shape):
    """BlockSpec for a grid-invariant operand (single-buffered when supported:
    its index_map is constant, so double-buffering would only waste VMEM)."""
    index_map = lambda i: (0,) * len(shape)
    if _single_buffered_ok():
        return pl.BlockSpec(shape, index_map,
                            pipeline_mode=pl.Buffered(buffer_count=1))
    return pl.BlockSpec(shape, index_map)


def _default_kron_min_n() -> int:
    """Smallest n that uses the Kronecker-factorized path.  v6e's high ridge
    (~650 flop/B) keeps a dense n=2048 matmul near its HBM roofline, so kron
    only pays from 4096 there; v5e (weak MXU) and v7x (3.2 TB/s HBM) are
    already MXU-bound at 2048."""
    try:
        kind = jax.devices()[0].device_kind.lower()
    except Exception:
        kind = ""
    if "v5" in kind or "v7" in kind:
        return 2048
    return 4096


def _round_down(x: int, m: int) -> int:
    return max(m, (x // m) * m)


def _pick_row_tile(rows_eff: int, n_eff: int, itemsize: int, align: int) -> int:
    """Largest tile targeting ~4 MiB of input per grid step (and >= ~1 MiB so
    per-step overhead stays negligible), keeping >= ~4 pipeline steps when the
    problem is big enough.  No ">= 8 steps" rule: the grid is a sequential
    loop on v5e/v6e, so bigger tiles win once DMA is hidden."""
    row_bytes = n_eff * itemsize
    tile = max(align, (4 * _MIB) // row_bytes)
    min_rows = max(align, _MIB // row_bytes)
    tile = min(tile, max(min_rows, rows_eff // 4))
    tile = _round_down(tile, align)
    if tile >= rows_eff:
        return rows_eff
    return tile


def _vmem_estimate(row_tile, n_eff, itemsize, h_bytes, h_bufs, kron, row_chunk, split):
    io = 2 * row_tile * n_eff * 2 * itemsize            # double-buffered in+out
    if kron:
        tmp = 5 * row_chunk * n_eff * 4                  # f32 temps + relayouts
    else:
        tmp = row_tile * n_eff * (8 if split else 4)     # f32 acc (+ hi/lo)
    return io + h_bufs * h_bytes + tmp + 2 * _MIB


# ---------------------------------------------------------------------------
# Public entry point
# ---------------------------------------------------------------------------

def hadamard_transform(x: jax.Array, do_rotate: bool = True, *,
                       kron_min_n=None) -> jax.Array:
    """Pallas TPU implementation of HadamardTransform.forward."""
    if not do_rotate:                 # module default: identity
        return x
    if x.size == 0:
        return x

    orig_shape, orig_dtype = x.shape, x.dtype
    n = orig_shape[-1]
    if n & (n - 1) != 0:
        # TODO(synk): non-power-of-two n needs the had_K (K > 1) fallback of
        # matmul_hadU_cuda; only the power-of-two (K == 1) path is implemented.
        raise NotImplementedError(
            f"hadamard_transform: last dim must be a power of two, got {n}")

    rows = math.prod(orig_shape[:-1])
    scale = 1.0 / math.sqrt(n)
    itemsize = orig_dtype.itemsize
    split = orig_dtype != jnp.bfloat16        # non-bf16 -> LHS bf16 hi/lo split
    align = 16 if orig_dtype == jnp.bfloat16 else 8
    h_bufs = 1 if _single_buffered_ok() else 2
    if kron_min_n is None:
        kron_min_n = _default_kron_min_n()

    vmem_cap = _vmem_capacity_bytes()
    budget = int(0.6 * vmem_cap)

    use_kron = n >= max(int(kron_min_n), 2048)

    if use_kron:
        # H_n = H_a (x) H_b with b = 128 (lane-dense stage operands) and
        # a = n // 128 >= 16: H storage a^2 + 128^2 instead of n^2, MXU work
        # n*(a+128) MACs/row instead of n^2.
        a, b = n // 128, 128
        rows_eff, n_eff = rows, n
        h_bytes = (a * a + b * b) * 2
        operands = (_hadamard_operand(a), _hadamard_operand(b))

        row_tile = _pick_row_tile(rows_eff, n_eff, itemsize, align)
        row_chunk = min(row_tile, 64 if split else 128)
        if row_tile > row_chunk:
            row_tile = _round_down(row_tile, row_chunk)
        while (row_tile > row_chunk and
               _vmem_estimate(row_tile, n_eff, itemsize, h_bytes, h_bufs,
                              True, row_chunk, split) > budget):
            row_tile = _round_down(row_tile // 2, row_chunk)
        est = _vmem_estimate(row_tile, n_eff, itemsize, h_bytes, h_bufs,
                             True, row_chunk, split)

        kernel = functools.partial(_hadamard_kron_kernel, a=a, b=b,
                                   scale=scale, row_chunk=row_chunk)
        grid = (pl.cdiv(rows_eff, row_tile),)
        in_specs = [pl.BlockSpec((row_tile * a, b), lambda i: (i, 0)),
                    _const_spec((a, a)), _const_spec((b, b))]
        out_specs = pl.BlockSpec((row_tile, a, b), lambda i: (i, 0, 0))
        call_args = (x.reshape(rows_eff * a, b),) + operands
        out_shape = jax.ShapeDtypeStruct((rows_eff, a, b), orig_dtype)
    else:
        # Small n (< 256): pack several logical rows per 256-wide physical row
        # and apply kron(I, H_n) -> lane-dense unmasked stores and a full
        # 256-lane MXU N dim on v6e/v7x; halves/quarters rows_eff.
        if n < 256 and (rows * n) % 256 == 0:
            n_eff = 256
        elif n < 128 and (rows * n) % 128 == 0:
            n_eff = 128
        else:
            n_eff = n
        repeat = n_eff // n
        rows_eff = (rows * n) // n_eff
        h_bytes = n_eff * n_eff * 2
        operands = (_hadamard_operand(n, repeat),)

        row_tile = _pick_row_tile(rows_eff, n_eff, itemsize, align)
        while (row_tile > align and
               _vmem_estimate(row_tile, n_eff, itemsize, h_bytes, h_bufs,
                              False, 0, split) > budget):
            row_tile = _round_down(row_tile // 2, align)
        est = _vmem_estimate(row_tile, n_eff, itemsize, h_bytes, h_bufs,
                             False, 0, split)

        kernel = functools.partial(_hadamard_dense_kernel, scale=scale)
        grid = (pl.cdiv(rows_eff, row_tile),)
        row_spec = pl.BlockSpec((row_tile, n_eff), lambda i: (i, 0))
        in_specs = [row_spec, _const_spec((n_eff, n_eff))]
        out_specs = row_spec
        call_args = (x.reshape(rows_eff, n_eff),) + operands
        out_shape = jax.ShapeDtypeStruct((rows_eff, n_eff), orig_dtype)

    vmem_limit = int(min(vmem_cap, max(32 * _MIB, est + 4 * _MIB)))

    out = pl.pallas_call(
        kernel,
        out_shape=out_shape,
        grid_spec=pltpu.PrefetchScalarGridSpec(
            num_scalar_prefetch=0,
            grid=grid,
            in_specs=in_specs,
            out_specs=out_specs),
        compiler_params=pltpu.CompilerParams(
            dimension_semantics=("parallel",),
            vmem_limit_bytes=vmem_limit),
    )(*call_args)

    return out.reshape(orig_shape)


# ---------------------------------------------------------------------------
# Self-test
# ---------------------------------------------------------------------------

if __name__ == "__main__":
    key = jax.random.PRNGKey(0)
    batch, seq, hidden = 2, 8, 32            # power-of-two hidden -> K == 1 path
    x = jax.random.normal(key, (batch, seq, hidden), dtype=jnp.float32)
    h64 = _sylvester_np(hidden).astype(np.float64)

    # f32, do_rotate=True: lane-packed (256-wide) dense path with the hi/lo split.
    y = jax.block_until_ready(hadamard_transform(x, do_rotate=True))
    assert y.shape == x.shape and y.dtype == x.dtype
    y_ref = (np.asarray(x, np.float64).reshape(-1, hidden) @ h64
             / math.sqrt(hidden)).reshape(x.shape)
    assert np.allclose(np.asarray(y, np.float64), y_ref, atol=1e-3, rtol=1e-3)

    # bf16 activations (single native-rate bf16 MXU matmul).
    xb = x.astype(jnp.bfloat16)
    yb = jax.block_until_ready(hadamard_transform(xb, do_rotate=True))
    assert yb.dtype == jnp.bfloat16
    xb64 = np.asarray(xb.astype(jnp.float32), np.float64)
    yb_ref = (xb64.reshape(-1, hidden) @ h64 / math.sqrt(hidden)).reshape(x.shape)
    assert np.allclose(np.asarray(yb.astype(jnp.float32), np.float64), yb_ref,
                       atol=5e-2, rtol=5e-2)

    # do_rotate=False -> identity (module default).
    y_id = jax.block_until_ready(hadamard_transform(x, do_rotate=False))
    assert jnp.array_equal(y_id, x)

    # Kronecker-factorized large-n path (forced via kron_min_n): n = 2048.
    xk = jax.random.normal(jax.random.PRNGKey(1), (64, 2048), dtype=jnp.float32)
    yk = jax.block_until_ready(hadamard_transform(xk, do_rotate=True,
                                                  kron_min_n=2048))
    hk64 = _sylvester_np(2048).astype(np.float64)
    yk_ref = np.asarray(xk, np.float64) @ hk64 / math.sqrt(2048)
    assert np.allclose(np.asarray(yk, np.float64), yk_ref, atol=2e-3, rtol=2e-3)

    print("KERNEL_OK")
</pallas_src>

<mosaic_0001>
module attributes {stable_mosaic.version = 11 : i64} {
  func.func @_hadamard_dense_kernel(%arg0: i32, %arg1: memref<2x256xf32, #tpu.memory_space<vmem>>, %arg2: memref<256x256xbf16, #tpu.memory_space<vmem>>, %arg3: memref<2x256xf32, #tpu.memory_space<vmem>>) attributes {dimension_semantics = [#tpu.dimension_semantics<parallel>], iteration_bounds = array<i64: 1>, scalar_prefetch = 0 : i64, scratch_operands = 0 : i64, tpu.core_type = #tpu.core_type<tc>, window_params = [{transform_indices = @transform_0, window_bounds = array<i64: 2, 256>}, {pipeline_mode = #tpu.pipeline_mode<synchronous>, transform_indices = @transform_1, window_bounds = array<i64: 256, 256>}, {transform_indices = @transform_2, window_bounds = array<i64: 2, 256>}]} {
    %c0 = arith.constant 0 : index
    %c0_0 = arith.constant 0 : index
    %0 = vector.load %arg1[%c0, %c0_0] : memref<2x256xf32, #tpu.memory_space<vmem>>, vector<2x256xf32>
    %c0_1 = arith.constant 0 : index
    %c0_2 = arith.constant 0 : index
    %1 = vector.load %arg2[%c0_1, %c0_2] : memref<256x256xbf16, #tpu.memory_space<vmem>>, vector<256x256xbf16>
    %2 = arith.truncf %0 : vector<2x256xf32> to vector<2x256xbf16>
    %3 = arith.extf %2 : vector<2x256xbf16> to vector<2x256xf32>
    %4 = arith.subf %0, %3 : vector<2x256xf32>
    %5 = arith.truncf %4 : vector<2x256xf32> to vector<2x256xbf16>
    %cst = arith.constant dense<0.000000e+00> : vector<2x256xf32>
    %6 = tpu.matmul %2, %1, %cst {dimension_numbers = #tpu.dot_dimension_numbers<[1], [0], [0], [1], [0, 0, 1, 1], [], []>} : vector<2x256xbf16>, vector<256x256xbf16>, vector<2x256xf32> -> vector<2x256xf32>
    %cst_3 = arith.constant dense<0.000000e+00> : vector<2x256xf32>
    %7 = tpu.matmul %5, %1, %cst_3 {dimension_numbers = #tpu.dot_dimension_numbers<[1], [0], [0], [1], [0, 0, 1, 1], [], []>} : vector<2x256xbf16>, vector<256x256xbf16>, vector<2x256xf32> -> vector<2x256xf32>
    %8 = arith.addf %6, %7 : vector<2x256xf32>
    %cst_4 = arith.constant 0.176776692 : f32
    %9 = vector.broadcast %cst_4 : f32 to vector<2x256xf32>
    %10 = arith.mulf %8, %9 : vector<2x256xf32>
    %c0_5 = arith.constant 0 : index
    %c0_6 = arith.constant 0 : index
    %11 = vector.load %arg3[%c0_5, %c0_6] : memref<2x256xf32, #tpu.memory_space<vmem>>, vector<2x256xf32>
    tpu.vector_store %arg3[%c0_5, %c0_6], %10 {strides = array<i32>} : memref<2x256xf32, #tpu.memory_space<vmem>>, vector<2x256xf32>,
    return
  }
  func.func @transform_0(%arg0: i32) -> (i32, i32) {
    %c0_i32 = arith.constant 0 : i32
    %c0_i32_0 = arith.constant 0 : i32
    return %arg0, %c0_i32 : i32, i32
  }
  func.func @transform_1(%arg0: i32) -> (i32, i32) {
    %c0_i32 = arith.constant 0 : i32
    %c0_i32_0 = arith.constant 0 : i32
    %c0_i32_1 = arith.constant 0 : i32
    return %c0_i32, %c0_i32_0 : i32, i32
  }
  func.func @transform_2(%arg0: i32) -> (i32, i32) {
    %c0_i32 = arith.constant 0 : i32
    %c0_i32_0 = arith.constant 0 : i32
    return %arg0, %c0_i32 : i32, i32
  }
}

</mosaic_0001>

<bundles_post_ra>
// kernel: tpu_custom_call.1
= control target key start
LH: loop header
LB: loop body
LE: loop exit
PB: predicated region body
PF: predicated region fallthrough
CT: control target
= control target key end

     0   :  { %7 = vsyncpa [#allocation3], 0  ;;  %s570_s0 = inlined_call_operand.hbm [shape: f32[2,256], index: 0, kind: input, shape index: {}]   ;;  %s571_s1 = inlined_call_operand.hbm [shape: bf16[256,256], index: 1, kind: input, shape index: {}]   ;;  %s572_s2 = inlined_call_operand.hbm [shape: f32[2,256], index: 2, kind: output, shape index: {}]  }
   0x1   :  { %8 = vsyncpa [#allocation6], 0 }
   0x2   :  { %9 = vsyncpa [#allocation4], 0  ;;  %s536_s9 = smov [#allocation2]   ;;  %s537_s11 = smov [#allocation5]  }
   0x3   :  { %s16_s10 = sshll.u32 %s536_s9, 4  ;;  %s25_s12 = sshll.u32 %s537_s11, 4  ;;  %s17_s10 = int_to_ptr.vmem [resolvable:$true] %s16_s10  ;;  %s26_s12 = int_to_ptr.vmem [resolvable:$true] %s25_s12 }
   0x4   :  { %s478_s13 = scalar_lea.vmem %s17_s10, 64  ;;  %p483_p1 = scmp.lt.s32.totalorder %s17_s10, %s17_s10 }
   0x5   :  { %p479_p0 = scmp.ne.s32.totalorder %s17_s10, %s478_s13  ;;  %p484_p2 = scmp.lt.s32.totalorder %s478_s13, %s478_s13 }
   0x7   :  { %p485_p3 = por %p484_p2, %p483_p1 }
   0x9   :  { %p486_p4 = pnand %p485_p3, %p479_p0 }
   0xb   :  { %489 = shalt.err (!%p486_p4)
}
   0xc   :  { %19 = dma.hbm_to_vmem [thread:$0]  %s570_s0, 64, %s17_s10, [#allocation3]  }
   0xd   :  { %s498_s16 = scalar_lea.vmem %s26_s12, 4096  ;;  %p503_p6 = scmp.lt.s32.totalorder %s26_s12, %s26_s12 }
   0xe   :  { %p499_p5 = scmp.ne.s32.totalorder %s26_s12, %s498_s16  ;;  %p504_p7 = scmp.lt.s32.totalorder %s498_s16, %s498_s16 }
  0x10   :  { %p505_p8 = por %p504_p7, %p503_p6 }
  0x12   :  { %p506_p9 = pnand %p505_p8, %p499_p5 }
  0x14   :  { %509 = shalt.err (!%p506_p9)
}
  0x15   :  { %s538_s17 = smov 128   ;;  %s539_s18 = smov 8  }
  0x16   :  { %31 = dma.hbm_to_vmem [thread:$0]  %s571_s1, 4096, %s26_s12, [#allocation6], %s538_s17, %s538_s17, %s539_s18  }
  0x17   :  { %530 = dma.done.wait [#allocation3], 64  }
  0x18   :  { %531 = vsyncadd [#allocation3], 4294967232 }
  0x19   :  { %532 = dma.done.wait [#allocation6], 4096  }
  0x1a   :  { %533 = vsyncadd [#allocation6], 4294963200  ;;  %v422_v0 = vld [vmem:[#allocation5 + $0x74] ss:$8 sps:$4 sm:$0xff]   ;;  %v424_v1 = vld [vmem:[#allocation5 + $0x70] ss:$8 sps:$4 sm:$0xff]   ;;  %v75_v9 = vlaneseq }
  0x1b   :  { %271 = vmatprep.subr.bf16.mxu0 %v422_v0  ;;  %312 = vmatprep.subr.bf16.mxu1 %v422_v0  ;;  %v425_v2 = vld [vmem:[#allocation5 + $0x64] ss:$8 sps:$4 sm:$0xff]   ;;  %v427_v3 = vld [vmem:[#allocation5 + $0x60] ss:$8 sps:$4 sm:$0xff]   ;;  %v428_v4 = vld [vmem:[#allocation5 + $0x54] ss:$8 sps:$4 sm:$0xff]  }
  0x1c   :  { %272 = vmatpush1.bf16.msra.mxu0 %v424_v1  ;;  %313 = vmatpush1.bf16.msra.mxu1 %v424_v1  ;;  %v430_v5 = vld [vmem:[#allocation5 + $0x50] ss:$8 sps:$4 sm:$0xff]   ;;  %v431_v6 = vld [vmem:[#allocation5 + $0x44] ss:$8 sps:$4 sm:$0xff]   ;;  %v540_v7 = vmov 1983009808  }
  0x1d   :  { %273 = vmatprep.subr.bf16.mxu0 %v425_v2  ;;  %314 = vmatprep.subr.bf16.mxu1 %v425_v2  ;;  %v73_v8 = vunpack.c.l.s4 %v540_v7  ;;  %v433_v10 = vld [vmem:[#allocation5 + $0x40] ss:$8 sps:$4 sm:$0xff]   ;;  %v434_v11 = vld [vmem:[#allocation5 + $0x34] ss:$8 sps:$4 sm:$0xff]   ;;  %v76_v13 = vshrl.u32 %v75_v9, 7  ;;  %s541_s0 = smov [#allocation7]  }
  0x1e   :  { %v436_v14 = vld [vmem:[#allocation5 + $0x30] ss:$8 sps:$4 sm:$0xff]   ;;  %v437_v15 = vld [vmem:[#allocation5 + $0x24] ss:$8 sps:$4 sm:$0xff]   ;;  %v439_v17 = vld [vmem:[#allocation5 + $0x20] ss:$8 sps:$4 sm:$0xff]  }
  0x1f   :  { %v74_v12 = vunpack.c.0.s8 %v73_v8  ;;  %v440_v18 = vld [vmem:[#allocation5 + $0x14] ss:$8 sps:$4 sm:$0xff]   ;;  %v442_v21 = vld [vmem:[#allocation5 + $0x10] ss:$8 sps:$4 sm:$0xff]   ;;  %v443_v22 = vld [vmem:[#allocation5 + $0x4] ss:$8 sps:$4 sm:$0xff]  }
  0x20   :  { %274 = vmatpush1.bf16.msra.mxu0 %v427_v3  ;;  %315 = vmatpush1.bf16.msra.mxu1 %v427_v3  ;;  %v38_v19 = vld [vmem:[#allocation2] sm:$0xf]  ;;  %v445_v27 = vld [vmem:[#allocation5] ss:$8 sps:$4 sm:$0xff]   ;;  %v448_v31 = vld [vmem:[#allocation5 + $0xf0] ss:$8 sps:$4 sm:$0xff]  }
  0x21   :  { %275 = vmatprep.subr.bf16.mxu0 %v428_v4  ;;  %316 = vmatprep.subr.bf16.mxu1 %v428_v4  ;;  %v77_v16 = vsub.s32 %v74_v12, %v76_v13  ;;  %v446_v28 = vld [vmem:[#allocation5 + $0xf4] ss:$8 sps:$4 sm:$0xff]   ;;  %v449_v32 = vld [vmem:[#allocation5 + $0xe4] ss:$8 sps:$4 sm:$0xff]   ;;  %v451_v35 = vld [vmem:[#allocation5 + $0xe0] ss:$8 sps:$4 sm:$0xff]  }
  0x22   :  { %v452_v36 = vld [vmem:[#allocation5 + $0xd4] ss:$8 sps:$4 sm:$0xff]   ;;  %v454_v39 = vld [vmem:[#allocation5 + $0xd0] ss:$8 sps:$4 sm:$0xff]   ;;  %v455_v40 = vld [vmem:[#allocation5 + $0xc4] ss:$8 sps:$4 sm:$0xff]  }
  0x23   :  { %v78_v20 = vrot.slane %v38_v19, %v77_v16  ;;  %v457_v42 = vld [vmem:[#allocation5 + $0xc0] ss:$8 sps:$4 sm:$0xff]   ;;  %v458_v43 = vld [vmem:[#allocation5 + $0xb4] ss:$8 sps:$4 sm:$0xff]   ;;  %v460_v44 = vld [vmem:[#allocation5 + $0xb0] ss:$8 sps:$4 sm:$0xff]  }
  0x24   :  { %276 = vmatpush1.bf16.msra.mxu0 %v430_v5  ;;  %317 = vmatpush1.bf16.msra.mxu1 %v430_v5  ;;  %v461_v45 = vld [vmem:[#allocation5 + $0xa4] ss:$8 sps:$4 sm:$0xff]   ;;  %v463_v46 = vld [vmem:[#allocation5 + $0xa0] ss:$8 sps:$4 sm:$0xff]   ;;  %v464_v47 = vld [vmem:[#allocation5 + $0x94] ss:$8 sps:$4 sm:$0xff]  }
  0x25   :  { %277 = vmatprep.subr.bf16.mxu0 %v431_v6  ;;  %318 = vmatprep.subr.bf16.mxu1 %v431_v6  ;;  %v79_v23 = vcombine.high %v78_v20, %v78_v20  ;;  %v563_v24 = vpack.c.bf16 %v78_v20, %v78_v20  ;;  %v466_v48 = vld [vmem:[#allocation5 + $0x90] ss:$8 sps:$4 sm:$0xff]   ;;  %v467_v49 = vld [vmem:[#allocation5 + $0x84] ss:$8 sps:$4 sm:$0xff]   ;;  %v469_v50 = vld [vmem:[#allocation5 + $0x80] ss:$8 sps:$4 sm:$0xff]  }
  0x26   :  { %s373_s1 = sshll.u32 %s541_s0, 4  ;;  %s374_s1 = int_to_ptr.vmem [resolvable:$true] %s373_s1 }
  0x27   :  { %v83_v25 = vpack.c.bf16 %v79_v23, %v79_v23  ;;  %v84_v26 = vunpack.c.l.bf16 %v563_v24  ;;  %s510_s21 = scalar_lea.vmem %s374_s1, 64  ;;  %p515_p11 = scmp.lt.s32.totalorder %s374_s1, %s374_s1 }
  0x28   :  { %278 = vmatpush1.bf16.msra.mxu0 %v433_v10  ;;  %319 = vmatpush1.bf16.msra.mxu1 %v433_v10  ;;  %p511_p10 = scmp.ne.s32.totalorder %s374_s1, %s510_s21  ;;  %p516_p12 = scmp.lt.s32.totalorder %s510_s21, %s510_s21 }
  0x29   :  { %279 = vmatprep.subr.bf16.mxu0 %v434_v11  ;;  %320 = vmatprep.subr.bf16.mxu1 %v434_v11  ;;  %v85_v29 = vunpack.c.l.bf16 %v83_v25 }
  0x2a   :  { %344 = vmatprep.mubr.bf16.mxu1 %v83_v25  ;;  %p517_p13 = por %p516_p12, %p515_p11 }
  0x2b   :  { %v88_v30 = vcombine.low %v84_v26, %v85_v29 }
  0x2c   :  { %280 = vmatpush1.bf16.msra.mxu0 %v436_v14  ;;  %321 = vmatpush1.bf16.msra.mxu1 %v436_v14  ;;  %p518_p0 = pnand %p517_p13, %p511_p10 }
  0x2d   :  { %281 = vmatprep.subr.bf16.mxu0 %v437_v15  ;;  %322 = vmatprep.subr.bf16.mxu1 %v437_v15  ;;  %v95_v33 = vrot.slane %v88_v30, %v77_v16 }
  0x2f   :  { %v97_v34 = vsub.f32 %v38_v19, %v95_v33 }
  0x30   :  { %282 = vmatpush1.bf16.msra.mxu0 %v439_v17  ;;  %323 = vmatpush1.bf16.msra.mxu1 %v439_v17 }
  0x31   :  { %283 = vmatprep.subr.bf16.mxu0 %v440_v18  ;;  %324 = vmatprep.subr.bf16.mxu1 %v440_v18  ;;  %v105_v37 = vrot.slane %v97_v34, %v77_v16 }
  0x33   :  { %v106_v38 = vcombine.high %v105_v37, %v105_v37  ;;  %v109_v51 = vpack.c.bf16 %v105_v37, %v105_v37 }
  0x34   :  { %284 = vmatpush1.bf16.msra.mxu0 %v442_v21  ;;  %325 = vmatpush1.bf16.msra.mxu1 %v442_v21 }
  0x35   :  { %285 = vmatprep.subr.bf16.mxu0 %v443_v22  ;;  %326 = vmatprep.subr.bf16.mxu1 %v443_v22  ;;  %v110_v41 = vpack.c.bf16 %v106_v38, %v106_v38 }
  0x37   :  { %303 = vmatprep.mubr.bf16.mxu0 %v110_v41 }
  0x38   :  { %286 = vmatpush1.bf16.msra.mxu0 %v445_v27  ;;  %327 = vmatpush1.bf16.msra.mxu1 %v445_v27 }
  0x39   :  { %287 = vmatprep.subr.bf16.mxu0 %v446_v28  ;;  %328 = vmatprep.subr.bf16.mxu1 %v446_v28 }
  0x3c   :  { %288 = vmatpush2.bf16.msra.mxu0 %v448_v31  ;;  %329 = vmatpush2.bf16.msra.mxu1 %v448_v31 }
  0x3d   :  { %289 = vmatprep.subr.bf16.mxu0 %v449_v32  ;;  %330 = vmatprep.subr.bf16.mxu1 %v449_v32 }
  0x40   :  { %290 = vmatpush2.bf16.msra.mxu0 %v451_v35  ;;  %331 = vmatpush2.bf16.msra.mxu1 %v451_v35 }
  0x41   :  { %291 = vmatprep.subr.bf16.mxu0 %v452_v36  ;;  %332 = vmatprep.subr.bf16.mxu1 %v452_v36 }
  0x44   :  { %292 = vmatpush2.bf16.msra.mxu0 %v454_v39  ;;  %333 = vmatpush2.bf16.msra.mxu1 %v454_v39 }
  0x45   :  { %293 = vmatprep.subr.bf16.mxu0 %v455_v40  ;;  %334 = vmatprep.subr.bf16.mxu1 %v455_v40 }
  0x48   :  { %294 = vmatpush2.bf16.msra.mxu0 %v457_v42  ;;  %335 = vmatpush2.bf16.msra.mxu1 %v457_v42 }
  0x49   :  { %295 = vmatprep.subr.bf16.mxu0 %v458_v43  ;;  %336 = vmatprep.subr.bf16.mxu1 %v458_v43 }
  0x4c   :  { %296 = vmatpush2.bf16.msra.mxu0 %v460_v44  ;;  %337 = vmatpush2.bf16.msra.mxu1 %v460_v44 }
  0x4d   :  { %297 = vmatprep.subr.bf16.mxu0 %v461_v45  ;;  %338 = vmatprep.subr.bf16.mxu1 %v461_v45 }
  0x50   :  { %298 = vmatpush2.bf16.msra.mxu0 %v463_v46  ;;  %339 = vmatpush2.bf16.msra.mxu1 %v463_v46 }
  0x51   :  { %299 = vmatprep.subr.bf16.mxu0 %v464_v47  ;;  %340 = vmatprep.subr.bf16.mxu1 %v464_v47 }
  0x54   :  { %300 = vmatpush2.bf16.msra.mxu0 %v466_v48  ;;  %341 = vmatpush2.bf16.msra.mxu1 %v466_v48 }
  0x55   :  { %301 = vmatprep.subr.bf16.mxu0 %v467_v49  ;;  %342 = vmatprep.subr.bf16.mxu1 %v467_v49 }
  0x58   :  { %302 = vmatpush2.bf16.msra.mxu0 %v469_v50  ;;  %343 = vmatpush2.bf16.msra.mxu1 %v469_v50 }
  0x5b   :  { %304 = vmatmul.mubr.bf16.vlgmr.msra.gmra.mxu0 %v109_v51  ;;  %345 = vmatmul.mubr.bf16.vlgmr.msra.gmra.mxu1 %v563_v24 }
 0x11b   :  { %v305_v52 = vpop.f32.mrf.mxu0  ;;  %v346_v53 = vpop.f32.mrf.mxu1 }
 0x11c   :  { %v347_v54 = vadd.f32 %v346_v53, %v305_v52 }
 0x11d   :  { %v307_v55 = vpop.f32.mrf.mxu0  ;;  %v348_v56 = vpop.f32.mrf.mxu1 }
 0x11e   :  { %v349_v57 = vadd.f32 %v348_v56, %v307_v55  ;;  %v353_v60 = vmul.f32 0.17677669, %v347_v54 }
 0x11f   :  { %v309_v58 = vpop.f32.mrf.mxu0  ;;  %v350_v59 = vpop.f32.mrf.mxu1 }
 0x120   :  { %v354_v61 = vmul.f32 0.17677669, %v349_v57 }
 0x121   :  { %v310_v62 = vpop.f32.mrf.mxu0  ;;  %v351_v63 = vpop.f32.mrf.mxu1 }
 0x122   :  { %v357_v0 = vcombine.low %v353_v60, %v354_v61 }
 0x124   :  { %415 = vst.sshfl [vmem:[#allocation7] sm:$0x33 pattern:$0x76325410] %v357_v0 }
 0x125   :  { %521 = shalt.err (!%p518_p0)
}
 0x126   :  { %376 = dma.vmem_to_hbm [thread:$0]  %s374_s1, 64, %s572_s2, [#allocation4]  }
 0x127   :  { %534 = dma.done.wait [#allocation4], 64  }
 0x128   :  { %535 = vsyncadd [#allocation4], 4294967232 }
 0x129   :  { %380 = vsyncpa [#allocation3], 1 }
 0x12a   :  { %381 = vsyncpa [#allocation6], 1 }
 0x12b   :  { %382 = vsyncpa [#allocation4], 1 }

</bundles_post_ra>
